<compile_context>
chip_gen: v6e
topology: v6e:2x2x1
jax: 0.10.0
libtpu: 0.0.40
codegen_flags: <defaults>
</compile_context>

<pallas_src>
import jax
import jax.numpy as jnp
from jax import lax
from jax.experimental import pallas as pl
from jax.experimental.pallas import tpu as pltpu

BN_EPS = 1e-5
LANE = 128
SUBLANE = 8


def _round_up(x: int, m: int) -> int:
    return (x + m - 1) // m * m


def _tpu_vmem_bytes() -> int:
    """Physical VMEM per TensorCore; conservative 64 MiB fallback (v7x-sized)."""
    try:
        return int(pltpu.get_tpu_info().vmem_capacity_bytes)
    except Exception:
        return 64 * 1024 * 1024


def _choose_tiles(n, c, hw, itemsize, budget):
    """Pick (tn, tc, ths) so one x tile stays <= `budget` bytes.

    Block-shape legality (last two dims of the x block):
      pooled path (tn, tc, ths): tc % 8 == 0 or tc == C; ths % 128 == 0 or ths == hw
      direct path (tn, tc):      tn % 8 == 0 or tn == N; tc % 128 == 0 or tc == C
    """
    # Channel tile: full C when small (always legal via "== full dim"),
    # otherwise 512 (multiple of both 8 and 128 -> legal on both paths).
    tc = c if c <= 1024 else 512

    # Spatial tile (lane axis of the x block on the pooled path).
    if hw <= 1:
        ths = 1
    elif SUBLANE * tc * hw * itemsize <= budget or hw <= LANE:
        ths = hw                                     # full spatial extent
    else:
        ths = max(LANE, budget // (SUBLANE * tc * itemsize) // LANE * LANE)
        ths = min(ths, max(LANE, hw // LANE * LANE))

    # Batch tile from the remaining budget, multiple of 8.
    tn = budget // max(1, tc * ths * itemsize)
    tn = max(SUBLANE, min(512, tn // SUBLANE * SUBLANE))
    # Megacore (v7x has 2 TCs): keep >= 2 tiles on the "parallel" N axis.
    if n >= 16:
        cap = max(SUBLANE, (_round_up(n, SUBLANE) // 2) // SUBLANE * SUBLANE)
        tn = min(tn, cap)
    # Never let the block exceed the array extent on the batch axis.
    if tn >= n:
        tn = n
    return tn, tc, ths


def _make_pool_linear_kernel(tc, c_tiles, c, hw, ths, s_tiles, pooled_path):
    mask_c = c_tiles * tc > c                         # ragged channel tail
    mask_s = pooled_path and (s_tiles * ths > hw)     # ragged spatial tail

    def kernel(x_ref, w_ref, y_ref):
        ci = pl.program_id(1)
        if pooled_path:
            si = pl.program_id(2)
            first = jnp.logical_and(ci == 0, si == 0)
        else:
            first = ci == 0

        # The output block is resident across both reduction axes -> it IS the
        # accumulator. Zero it on the first reduction step of every N tile.
        @pl.when(first)
        def _():
            y_ref[...] = jnp.zeros_like(y_ref)

        x = x_ref[...]
        if pooled_path:
            if mask_s:
                lane = lax.broadcasted_iota(jnp.int32, x.shape, 2)
                x = jnp.where(lane + si * ths < hw, x, jnp.zeros_like(x))
            # Global average pool: spatial sum in f32 (the 1/(H*W) divisor is
            # folded into w). Works for bf16 inputs too.
            lhs = jnp.sum(x, axis=2, dtype=jnp.float32)          # (tn, tc)
        else:
            lhs = x
        if mask_c:
            cid = lax.broadcasted_iota(jnp.int32, lhs.shape, 1)
            lhs = jnp.where(cid + ci * tc < c, lhs, jnp.zeros_like(lhs))

        # Weight is fully VMEM-resident (constant index_map); slice per C tile.
        if c_tiles == 1:
            w_blk = w_ref[...]
        else:
            w_blk = w_ref[pl.ds(pl.multiple_of(ci * tc, LANE), tc), :]

        y_ref[...] += jnp.dot(lhs, w_blk, preferred_element_type=jnp.float32)

    return kernel


def _batchnorm_kernel(y_ref, gamma_ref, beta_ref, o_ref):
    # BatchNorm1d, training mode: batch statistics, biased variance, eps=1e-5,
    # computed over the WHOLE batch in one block, with a folded affine.
    y = y_ref[...]
    mean = jnp.mean(y, axis=0, keepdims=True)
    var = jnp.mean((y - mean) ** 2, axis=0, keepdims=True)
    scale = gamma_ref[...] * lax.rsqrt(var + BN_EPS)
    shift = beta_ref[...] - mean * scale
    o_ref[...] = (y * scale + shift).astype(o_ref.dtype)


def _x_block_spec(block_shape, index_map, deep_buffering):
    if deep_buffering:
        try:
            return pl.BlockSpec(block_shape, index_map,
                                pipeline_mode=pl.Buffered(3))
        except (TypeError, AttributeError):
            pass
    return pl.BlockSpec(block_shape, index_map)


def bbox_regressor_forward(x, w, b, gamma, beta):
    """Forward of BboxRegressor (RCNN_bbox_bn=True, training-mode BatchNorm1d).

    x:     (N, C, H, W) NCHW feature map, or (N, C) already-pooled features.
    w:     (O, C)  Linear weight   (O = 4 * num_classes)
    b:     (O,)    Linear bias     (mathematically cancelled by the BN below)
    gamma: (O,)    BatchNorm1d weight
    beta:  (O,)    BatchNorm1d bias
    Returns (N, O) float32.
    """
    del b  # Exactly cancelled by training-mode BatchNorm1d's batch-mean subtraction.

    if x.ndim == 4:
        N, C, H, W = x.shape
        hw = H * W
    elif x.ndim == 2:
        N, C = x.shape
        hw = 1
    else:
        raise ValueError("expected 2D or 4D input")

    pooled_path = hw > 1
    x_in = x.reshape(N, C, hw) if pooled_path else x.reshape(N, C)

    O = w.shape[0]
    O_pad = _round_up(O, LANE)                 # lane-dense output stores
    itemsize = jnp.dtype(x_in.dtype).itemsize  # bf16 inputs stay bf16 in HBM stream

    phys_vmem = _tpu_vmem_bytes()
    x_budget = (8 * 1024 * 1024 if phys_vmem <= 64 * 1024 * 1024
                else 14 * 1024 * 1024)

    tn, tc, ths = _choose_tiles(N, C, hw, itemsize, x_budget)
    n_tiles = pl.cdiv(N, tn)
    c_tiles = pl.cdiv(C, tc)
    s_tiles = pl.cdiv(hw, ths) if pooled_path else 1

    # Linear weight: transposed, 1/(H*W) divisor folded in, zero padded so the
    # in-kernel pl.ds slice and the O lane padding are exact.
    C_pad = c_tiles * tc
    wscale = 1.0 / float(hw) if pooled_path else 1.0
    w_p = (jnp.zeros((C_pad, O_pad), jnp.float32)
           .at[:C, :O].set(w.T.astype(jnp.float32) * wscale))
    g_p = jnp.zeros((1, O_pad), jnp.float32).at[0, :O].set(gamma.astype(jnp.float32))
    bt_p = jnp.zeros((1, O_pad), jnp.float32).at[0, :O].set(beta.astype(jnp.float32))

    x_tile_bytes = tn * tc * (ths if pooled_path else 1) * itemsize
    total_steps = n_tiles * c_tiles * s_tiles
    deep_buffering = (x_tile_bytes <= (2 << 20)) and (total_steps >= 4)
    x_buffers = 3 if deep_buffering else 2

    kernel = _make_pool_linear_kernel(tc, c_tiles, C, hw, ths, s_tiles, pooled_path)

    if pooled_path:
        grid = (n_tiles, c_tiles, s_tiles)
        x_spec = _x_block_spec((tn, tc, ths), lambda i, c, s: (i, c, s), deep_buffering)
        w_spec = pl.BlockSpec((C_pad, O_pad), lambda i, c, s: (0, 0))
        y_spec = pl.BlockSpec((tn, O_pad), lambda i, c, s: (i, 0))
        semantics = ("parallel", "arbitrary", "arbitrary")
    else:
        grid = (n_tiles, c_tiles)
        x_spec = _x_block_spec((tn, tc), lambda i, c: (i, c), deep_buffering)
        w_spec = pl.BlockSpec((C_pad, O_pad), lambda i, c: (0, 0))
        y_spec = pl.BlockSpec((tn, O_pad), lambda i, c: (i, 0))
        semantics = ("parallel", "arbitrary")

    # VMEM limit sized from the actual working set, capped generation-aware
    # (<= 3/4 of physical: 48 MiB on v7x's 64 MiB, 96 MiB on v5e/v6e's 128 MiB).
    vmem_bytes = (x_buffers * x_tile_bytes
                  + 2 * C_pad * O_pad * 4
                  + 2 * tn * O_pad * 4
                  + 6 * 1024 * 1024)
    vmem_bytes = int(min(max(vmem_bytes, 24 * 1024 * 1024), phys_vmem * 3 // 4))

    y = pl.pallas_call(
        kernel,
        out_shape=jax.ShapeDtypeStruct((N, O_pad), jnp.float32),
        grid=grid,
        in_specs=[x_spec, w_spec],
        out_specs=y_spec,
        compiler_params=pltpu.CompilerParams(
            dimension_semantics=semantics,
            vmem_limit_bytes=vmem_bytes,
        ),
    )(x_in, w_p)

    # BatchNorm over the whole batch: (N, O_pad) is tiny -> single block.
    # TODO(synk): PyTorch BatchNorm1d in training mode also updates
    # running_mean/running_var (momentum 0.1); only the forward output is produced.
    out = pl.pallas_call(
        _batchnorm_kernel,
        out_shape=jax.ShapeDtypeStruct((N, O_pad), jnp.float32),
        in_specs=[
            pl.BlockSpec((N, O_pad), lambda: (0, 0)),
            pl.BlockSpec((1, O_pad), lambda: (0, 0)),
            pl.BlockSpec((1, O_pad), lambda: (0, 0)),
        ],
        out_specs=pl.BlockSpec((N, O_pad), lambda: (0, 0)),
    )(y, g_p, bt_p)

    return out[:, :O]


if __name__ == "__main__":
    # Small deterministic config consistent with the module.
    N, C, H, W = 2, 4, 16, 16
    num_classes = 2
    O = 4 * num_classes  # 8

    key = jax.random.PRNGKey(0)
    k_x, k_w, k_g = jax.random.split(key, 3)

    # Input feature map (NCHW, like the PyTorch module expects).
    x = jax.random.normal(k_x, (N, C, H, W), dtype=jnp.float32)

    # Parameters, initialized exactly as in __init__:
    #   linear weight ~ N(0, 0.01), linear bias = 0,
    #   BN weight ~ N(0, 0.01), BN bias = 0.
    w = 0.01 * jax.random.normal(k_w, (O, C), dtype=jnp.float32)
    b = jnp.zeros((O,), dtype=jnp.float32)
    gamma = 0.01 * jax.random.normal(k_g, (O,), dtype=jnp.float32)
    beta = jnp.zeros((O,), dtype=jnp.float32)

    out = bbox_regressor_forward(x, w, b, gamma, beta)
    out = jax.block_until_ready(out)

    # Pure-JAX reference of the PyTorch forward (training-mode BatchNorm1d).
    pooled_ref = jnp.mean(x, axis=(2, 3))
    y_ref = pooled_ref @ w.T + b
    m = jnp.mean(y_ref, axis=0, keepdims=True)
    v = jnp.mean((y_ref - m) ** 2, axis=0, keepdims=True)
    ref = (y_ref - m) / jnp.sqrt(v + BN_EPS) * gamma + beta

    assert out.shape == (N, O)
    assert jnp.allclose(out, ref, atol=1e-5, rtol=1e-5), "mismatch vs reference"

    print("KERNEL_OK")
</pallas_src>

<mosaic_0001>
module attributes {stable_mosaic.version = 11 : i64} {
  func.func @kernel(%arg0: i32, %arg1: i32, %arg2: i32, %arg3: memref<2x4x256xf32, #tpu.memory_space<vmem>>, %arg4: memref<4x128xf32, #tpu.memory_space<vmem>>, %arg5: memref<2x128xf32, #tpu.memory_space<vmem>>) attributes {dimension_semantics = [#tpu.dimension_semantics<parallel>, #tpu.dimension_semantics<arbitrary>, #tpu.dimension_semantics<arbitrary>], iteration_bounds = array<i64: 1, 1, 1>, scalar_prefetch = 0 : i64, scratch_operands = 0 : i64, tpu.core_type = #tpu.core_type<tc>, window_params = [{transform_indices = @transform_0, window_bounds = array<i64: 2, 4, 256>}, {pipeline_mode = #tpu.pipeline_mode<synchronous>, transform_indices = @transform_1, window_bounds = array<i64: 4, 128>}, {transform_indices = @transform_2, window_bounds = array<i64: 2, 128>}]} {
    %c0_i32 = arith.constant 0 : i32
    %0 = arith.cmpi eq, %arg1, %c0_i32 : i32
    %c0_i32_0 = arith.constant 0 : i32
    %1 = arith.cmpi eq, %arg2, %c0_i32_0 : i32
    %2 = arith.andi %0, %1 : i1
    %3 = arith.extui %2 : i1 to i32
    %c0_i32_1 = arith.constant 0 : i32
    %4 = arith.cmpi ne, %3, %c0_i32_1 : i32
    scf.if %4 {
      %cst_11 = arith.constant 0.000000e+00 : f32
      %12 = vector.broadcast %cst_11 : f32 to vector<2x128xf32>
      %c0_12 = arith.constant 0 : index
      %c0_13 = arith.constant 0 : index
      %13 = vector.load %arg5[%c0_12, %c0_13] : memref<2x128xf32, #tpu.memory_space<vmem>>, vector<2x128xf32>
      tpu.vector_store %arg5[%c0_12, %c0_13], %12 {strides = array<i32>} : memref<2x128xf32, #tpu.memory_space<vmem>>, vector<2x128xf32>,
    } else {
    }
    %c0 = arith.constant 0 : index
    %c0_2 = arith.constant 0 : index
    %c0_3 = arith.constant 0 : index
    %5 = vector.load %arg3[%c0, %c0_2, %c0_3] : memref<2x4x256xf32, #tpu.memory_space<vmem>>, vector<2x4x256xf32>
    %cst = arith.constant dense<0.000000e+00> : vector<2x4xf32>
    %6 = vector.multi_reduction <add>, %5, %cst [2] : vector<2x4x256xf32> to vector<2x4xf32>
    %c0_4 = arith.constant 0 : index
    %c0_5 = arith.constant 0 : index
    %7 = vector.load %arg4[%c0_4, %c0_5] : memref<4x128xf32, #tpu.memory_space<vmem>>, vector<4x128xf32>
    %c0_6 = arith.constant 0 : index
    %c0_7 = arith.constant 0 : index
    %8 = vector.load %arg5[%c0_6, %c0_7] : memref<2x128xf32, #tpu.memory_space<vmem>>, vector<2x128xf32>
    %cst_8 = arith.constant dense<0.000000e+00> : vector<2x128xf32>
    %9 = tpu.matmul %6, %7, %cst_8 {dimension_numbers = #tpu.dot_dimension_numbers<[1], [0], [0], [1], [0, 0, 1, 1], [], []>} : vector<2x4xf32>, vector<4x128xf32>, vector<2x128xf32> -> vector<2x128xf32>
    %10 = arith.addf %8, %9 : vector<2x128xf32>
    %c0_9 = arith.constant 0 : index
    %c0_10 = arith.constant 0 : index
    %11 = vector.load %arg5[%c0_9, %c0_10] : memref<2x128xf32, #tpu.memory_space<vmem>>, vector<2x128xf32>
    tpu.vector_store %arg5[%c0_9, %c0_10], %10 {strides = array<i32>} : memref<2x128xf32, #tpu.memory_space<vmem>>, vector<2x128xf32>,
    return
  }
  func.func @transform_0(%arg0: i32, %arg1: i32, %arg2: i32) -> (i32, i32, i32) {
    %c0_i32 = arith.constant 0 : i32
    return %arg0, %arg1, %arg2 : i32, i32, i32
  }
  func.func @transform_1(%arg0: i32, %arg1: i32, %arg2: i32) -> (i32, i32) {
    %c0_i32 = arith.constant 0 : i32
    %c0_i32_0 = arith.constant 0 : i32
    %c0_i32_1 = arith.constant 0 : i32
    return %c0_i32, %c0_i32_0 : i32, i32
  }
  func.func @transform_2(%arg0: i32, %arg1: i32, %arg2: i32) -> (i32, i32) {
    %c0_i32 = arith.constant 0 : i32
    %c0_i32_0 = arith.constant 0 : i32
    return %arg0, %c0_i32 : i32, i32
  }
}

</mosaic_0001>

<bundles_post_ra>
// kernel: tpu_custom_call.1
= control target key start
LH: loop header
LB: loop body
LE: loop exit
PB: predicated region body
PF: predicated region fallthrough
CT: control target
= control target key end

     0   :  { %7 = vsyncpa [#allocation3], 0  ;;  %s294_s0 = inlined_call_operand.hbm [shape: f32[2,4,256], index: 0, kind: input, shape index: {}]   ;;  %s295_s1 = inlined_call_operand.hbm [shape: f32[4,128], index: 1, kind: input, shape index: {}]   ;;  %s296_s2 = inlined_call_operand.hbm [shape: f32[2,128], index: 2, kind: output, shape index: {}]  }
   0x1   :  { %8 = vsyncpa [#allocation6], 0 }
   0x2   :  { %9 = vsyncpa [#allocation4], 0  ;;  %s258_s9 = smov [#allocation2]  }
   0x3   :  { %s15_s10 = sshll.u32 %s258_s9, 4  ;;  %s16_s10 = int_to_ptr.vmem [resolvable:$true] %s15_s10 }
   0x4   :  { %s200_s11 = scalar_lea.vmem %s16_s10, 256  ;;  %p205_p1 = scmp.lt.s32.totalorder %s16_s10, %s16_s10 }
   0x5   :  { %p201_p0 = scmp.ne.s32.totalorder %s16_s10, %s200_s11  ;;  %p206_p2 = scmp.lt.s32.totalorder %s200_s11, %s200_s11 }
   0x7   :  { %p207_p3 = por %p206_p2, %p205_p1 }
   0x9   :  { %p208_p4 = pnand %p207_p3, %p201_p0 }
   0xb   :  { %211 = shalt.err (!%p208_p4)
}
   0xc   :  { %s259_s12 = smov 128   ;;  %s260_s13 = smov 8  }
   0xd   :  { %21 = dma.hbm_to_vmem [thread:$0]  %s294_s0, 256, %s16_s10, [#allocation3], %s259_s12, %s259_s12, %s260_s13  }
   0xe   :  { %s261_s16 = smov [#allocation5]  }
   0xf   :  { %s28_s17 = sshll.u32 %s261_s16, 4  ;;  %s29_s17 = int_to_ptr.vmem [resolvable:$true] %s28_s17 }
  0x10   :  { %s220_s18 = scalar_lea.vmem %s29_s17, 64  ;;  %p225_p6 = scmp.lt.s32.totalorder %s29_s17, %s29_s17 }
  0x11   :  { %p221_p5 = scmp.ne.s32.totalorder %s29_s17, %s220_s18  ;;  %p226_p7 = scmp.lt.s32.totalorder %s220_s18, %s220_s18 }
  0x13   :  { %p227_p8 = por %p226_p7, %p225_p6 }
  0x15   :  { %p228_p9 = pnand %p227_p8, %p221_p5 }
  0x17   :  { %231 = shalt.err (!%p228_p9)
}
  0x18   :  { %31 = dma.hbm_to_vmem [thread:$0]  %s295_s1, 64, %s29_s17, [#allocation6]  }
  0x19   :  { %252 = dma.done.wait [#allocation3], 256  }
  0x1a   :  { %253 = vsyncadd [#allocation3], 4294967040 }
  0x1b   :  { %254 = dma.done.wait [#allocation6], 64  }
  0x1c   :  { %255 = vsyncadd [#allocation6], 4294967232  ;;  %vm53_vm0 = vcmask 1043456   ;;  %v45_v0 = vld [vmem:[#allocation2] sm:$0xff]  ;;  %v46_v1 = vld [vmem:[#allocation2 + $0x8] sm:$0xff]  ;;  %v262_v11 = vmov 0.0   ;;  %v68_v12 = vlaneseq }
  0x1d   :  { %v49_v2 = vcombine.high %v45_v0, %v45_v0  ;;  %v54_v3 = vsel %vm53_vm0, %v45_v0, 0.0  ;;  %v50_v4 = vcombine.high %v46_v1, %v46_v1  ;;  %v59_v6 = vsel %vm53_vm0, %v46_v1, 0.0  ;;  %v64_v10 = vld [vmem:[#allocation5] sm:$0xf]  ;;  %44 = vst [vmem:[#allocation7] sm:$0x3] %v262_v11  ;;  %178 = vmatprep.subr.mxu0 %v262_v11 }
  0x1e   :  { %vm263_vm1 = vmmov 0   ;;  %179 = vmatpush3.msk.msra.mxu0 %vm53_vm0, %v64_v10  ;;  %v69_v13 = vand.u32 127, %v68_v12  ;;  %v71_v14 = vshrl.u32 %v68_v12, 7  ;;  %vm78_vm2 = vcmask 1041409   ;;  %s264_s0 = smov [#allocation7]  }
  0x1f   :  { %v55_v5 = vsel %vm53_vm0, %v49_v2, 0.0  ;;  %v60_v7 = vsel %vm53_vm0, %v50_v4, 0.0  ;;  %180 = vmatprep.mubr.msk.f32.mxu0 %vm263_vm1, %v262_v11  ;;  %vm80_vm3 = vcmask 31744   ;;  %s164_s1 = sshll.u32 %s264_s0, 4  ;;  %s165_s1 = int_to_ptr.vmem [resolvable:$true] %s164_s1 }
  0x20   :  { %v56_v8 = vadd.f32 %v55_v5, %v54_v3  ;;  %v61_v9 = vadd.f32 %v60_v7, %v59_v6  ;;  %v72_v16 = vsub.s32 %v69_v13, %v71_v14  ;;  %s232_s21 = scalar_lea.vmem %s165_s1, 32  ;;  %p237_p11 = scmp.lt.s32.totalorder %s165_s1, %s165_s1 }
  0x21   :  { %p233_p10 = scmp.ne.s32.totalorder %s165_s1, %s232_s21  ;;  %p238_p12 = scmp.lt.s32.totalorder %s232_s21, %s232_s21 }
  0x22   :  { %57 = vadd.xlane.f32.xlu0 %v56_v8 }
  0x23   :  { %p239_p13 = por %p238_p12, %p237_p11 }
  0x24   :  { %v65_v21 = vld [vmem:[#allocation7] sm:$0x3] }
  0x25   :  { %p240_p0 = pnand %p239_p13, %p233_p10 }
  0x26   :  { %62 = vadd.xlane.f32.xlu0 %v61_v9 }
  0xab   :  { %v58_v15 = vpop.xlane.xlu0 %57 }
  0xac   :  { %v73_v18 = vrot.slane %v58_v15, %v72_v16 }
  0xaf   :  { %v63_v17 = vpop.xlane.xlu0 %62 }
  0xb0   :  { %v77_v19 = vrot.slane %v63_v17, %v72_v16 }
  0xb2   :  { %v79_v20 = vsel %vm78_vm2, %v77_v19, %v73_v18 }
  0xb3   :  { %181 = vmatmul.mubr.msk.f32.vlgmr.msra.gmra.mxu0 %vm80_vm3, %v79_v20 }
 0x173   :  { %v152_v22 = vpop.f32.mrf.mxu0 }
 0x174   :  { %v156_v23 = vadd.f32 %v152_v22, %v65_v21 }
 0x175   :  { %v182_v24 = vpop.f32.mrf.mxu0 }
 0x176   :  { %157 = vst [vmem:[#allocation7] sm:$0x3] %v156_v23 }
 0x177   :  { %243 = shalt.err (!%p240_p0)
}
 0x178   :  { %167 = dma.vmem_to_hbm [thread:$0]  %s165_s1, 32, %s296_s2, [#allocation4]  }
 0x179   :  { %256 = dma.done.wait [#allocation4], 32  }
 0x17a   :  { %257 = vsyncadd [#allocation4], 4294967264 }
 0x17b   :  { %171 = vsyncpa [#allocation3], 1 }
 0x17c   :  { %172 = vsyncpa [#allocation6], 1 }
 0x17d   :  { %173 = vsyncpa [#allocation4], 1 }

</bundles_post_ra>
